<compile_context>
chip_gen: v7x
topology: tpu7x:2x2x1
jax: 0.10.0
libtpu: 0.0.40
codegen_flags: <defaults>
</compile_context>

<pallas_src>
import functools
from typing import List, Tuple

import jax
import jax.numpy as jnp
from jax.experimental import pallas as pl
from jax.experimental.pallas import tpu as pltpu

LANE = 128          # lane-dense feature padding
SUBLANE = 8         # f32 sublane granularity for batch tiles
MAX_BATCH_TILE = 512


def _round_up(n: int, m: int) -> int:
    return ((n + m - 1) // m) * m


# ----------------------------------------------------------------------------
# Fused Pallas kernel: full encoder + decoder on one batch tile.
# ----------------------------------------------------------------------------
def _make_fused_ae_kernel(n_enc: int, n_dec: int):
    n_layers = n_enc + n_dec

    def kernel(*refs):
        x_ref = refs[0]
        wb = refs[1:1 + 2 * n_layers]          # w0, b0, w1, b1, ...
        z_ref, xp_ref = refs[1 + 2 * n_layers:]

        h = x_ref[...]                         # (TB, Din_pad) f32

        # Encoder: ReLU after every layer except the last.
        for i in range(n_enc):
            w_ref, b_ref = wb[2 * i], wb[2 * i + 1]
            h = jnp.dot(h, w_ref[...],
                        preferred_element_type=jnp.float32) + b_ref[...]
            if i != n_enc - 1:
                h = jnp.maximum(h, 0.0)
        z_ref[...] = h.astype(z_ref.dtype)     # latent code (no ReLU on z)

        # Decoder: ReLU after every layer except the last.
        for j in range(n_dec):
            w_ref, b_ref = wb[2 * (n_enc + j)], wb[2 * (n_enc + j) + 1]
            h = jnp.dot(h, w_ref[...],
                        preferred_element_type=jnp.float32) + b_ref[...]
            if j != n_dec - 1:
                h = jnp.maximum(h, 0.0)
        xp_ref[...] = h.astype(xp_ref.dtype)

    return kernel


def fused_autoencoder_pallas(x_pad: jax.Array,
                             enc_params_p, dec_params_p,
                             batch_tile: int):
    """x_pad: (B_pad, Din_pad); params are pre-padded (in_pad, out_pad)/(1, out_pad)."""
    B_pad, Din_p = x_pad.shape
    n_enc, n_dec = len(enc_params_p), len(dec_params_p)
    z_p = enc_params_p[-1][0].shape[1]
    out_p = dec_params_p[-1][0].shape[1]
    assert B_pad % batch_tile == 0

    grid = (B_pad // batch_tile,)

    in_specs = [pl.BlockSpec((batch_tile, Din_p), lambda i: (i, 0))]
    flat_params = []
    for (w, b) in list(enc_params_p) + list(dec_params_p):
        # Weights / biases stay resident across the batch grid (constant index map).
        in_specs.append(pl.BlockSpec(w.shape, lambda i: (0, 0)))
        in_specs.append(pl.BlockSpec(b.shape, lambda i: (0, 0)))
        flat_params += [w, b]

    out_specs = [
        pl.BlockSpec((batch_tile, z_p), lambda i: (i, 0)),
        pl.BlockSpec((batch_tile, out_p), lambda i: (i, 0)),
    ]
    out_shape = [
        jax.ShapeDtypeStruct((B_pad, z_p), x_pad.dtype),
        jax.ShapeDtypeStruct((B_pad, out_p), x_pad.dtype),
    ]

    kernel = _make_fused_ae_kernel(n_enc, n_dec)
    z_pad, xp_pad = pl.pallas_call(
        kernel,
        grid=grid,
        in_specs=in_specs,
        out_specs=out_specs,
        out_shape=out_shape,
        compiler_params=pltpu.CompilerParams(
            # Batch tiles are independent -> shard across TCs on v7x (megacore).
            dimension_semantics=("parallel",)),
    )(x_pad, *flat_params)
    return z_pad, xp_pad


# ----------------------------------------------------------------------------
# Parameter init (unpadded, torch.nn.Linear-style) + lane-dense padding.
# ----------------------------------------------------------------------------
def init_mlp_params(key: jax.Array, dims: List[int]):
    """Returns list of (w_t, b): w_t is (in, out) (pre-transposed), b is (out,)."""
    params = []
    for din, dout in zip(dims[:-1], dims[1:]):
        key, kw, kb = jax.random.split(key, 3)
        bound = float(din) ** -0.5
        w_t = jax.random.uniform(kw, (din, dout), jnp.float32, -bound, bound)
        b = jax.random.uniform(kb, (dout,), jnp.float32, -bound, bound)
        params.append((w_t, b))
    return params


def pad_mlp_params(params):
    """Zero-pad each layer to (in_pad, out_pad) / (1, out_pad) with pads multiple of 128."""
    padded = []
    for (w_t, b) in params:
        din, dout = w_t.shape
        din_p, dout_p = _round_up(din, LANE), _round_up(dout, LANE)
        w_p = jnp.zeros((din_p, dout_p), jnp.float32).at[:din, :dout].set(w_t)
        b_p = jnp.zeros((1, dout_p), jnp.float32).at[:, :dout].set(b)
        padded.append((w_p, b_p))
    return padded


# ----------------------------------------------------------------------------
# User-facing forward: pad -> single fused kernel -> strip padding.
# ----------------------------------------------------------------------------
def basic_autoencoder_forward(enc_params_p, dec_params_p, x: jax.Array,
                              z_dim: int, out_dim: int
                              ) -> Tuple[jax.Array, jax.Array]:
    B, Din = x.shape
    Din_p = _round_up(Din, LANE)
    batch_tile = min(_round_up(B, SUBLANE), MAX_BATCH_TILE)
    B_pad = _round_up(B, batch_tile)

    x_pad = jnp.zeros((B_pad, Din_p), x.dtype).at[:B, :Din].set(x)
    z_pad, xp_pad = fused_autoencoder_pallas(x_pad, enc_params_p, dec_params_p,
                                             batch_tile)
    z = z_pad[:B, :z_dim]
    x_pred = xp_pad[:B, :out_dim]
    return x_pred, z


# ----------------------------------------------------------------------------
# Pure-JAX reference for the correctness check.
# ----------------------------------------------------------------------------
def mlp_forward_ref(params, x):
    n = len(params)
    for i, (w_t, b) in enumerate(params):
        x = x @ w_t + b
        if i != n - 1:
            x = jnp.maximum(x, 0.0)
    return x


if __name__ == "__main__":
    # Small, MLP-consistent shapes: batch=8, features 64 -> 32 -> 16 -> 32 -> 64.
    encoder_dims = [64, 32, 16]
    decoder_dims = [16, 32, 64]
    batch = 8

    key = jax.random.PRNGKey(0)
    k_x, k_enc, k_dec = jax.random.split(key, 3)

    x = jax.random.normal(k_x, (batch, encoder_dims[0]), jnp.float32)
    enc_params = init_mlp_params(k_enc, encoder_dims)
    dec_params = init_mlp_params(k_dec, decoder_dims)

    # Pad params once (outside the per-call path) so biases/weights are lane-dense.
    enc_params_p = pad_mlp_params(enc_params)
    dec_params_p = pad_mlp_params(dec_params)

    fwd = jax.jit(functools.partial(basic_autoencoder_forward,
                                    z_dim=encoder_dims[-1],
                                    out_dim=decoder_dims[-1]))
    x_pred, z = fwd(enc_params_p, dec_params_p, x)
    jax.block_until_ready((x_pred, z))

    # Correctness check vs. pure-JAX reference on the unpadded params.
    z_ref = mlp_forward_ref(enc_params, x)
    x_pred_ref = mlp_forward_ref(dec_params, z_ref)
    assert z.shape == (batch, encoder_dims[-1])
    assert x_pred.shape == (batch, decoder_dims[-1])
    assert jnp.allclose(z, z_ref, atol=1e-5, rtol=1e-5)
    assert jnp.allclose(x_pred, x_pred_ref, atol=1e-5, rtol=1e-5)

    print("KERNEL_OK")
</pallas_src>

<mosaic_0001>
module attributes {stable_mosaic.version = 11 : i64} {
  func.func @kernel(%arg0: i32, %arg1: memref<8x128xf32, #tpu.memory_space<vmem>>, %arg2: memref<128x128xf32, #tpu.memory_space<vmem>>, %arg3: memref<1x128xf32, #tpu.memory_space<vmem>>, %arg4: memref<128x128xf32, #tpu.memory_space<vmem>>, %arg5: memref<1x128xf32, #tpu.memory_space<vmem>>, %arg6: memref<128x128xf32, #tpu.memory_space<vmem>>, %arg7: memref<1x128xf32, #tpu.memory_space<vmem>>, %arg8: memref<128x128xf32, #tpu.memory_space<vmem>>, %arg9: memref<1x128xf32, #tpu.memory_space<vmem>>, %arg10: memref<8x128xf32, #tpu.memory_space<vmem>>, %arg11: memref<8x128xf32, #tpu.memory_space<vmem>>) attributes {dimension_semantics = [#tpu.dimension_semantics<parallel>], iteration_bounds = array<i64: 1>, scalar_prefetch = 0 : i64, scratch_operands = 0 : i64, tpu.core_type = #tpu.core_type<tc>, window_params = [{transform_indices = @transform_0, window_bounds = array<i64: 8, 128>}, {pipeline_mode = #tpu.pipeline_mode<synchronous>, transform_indices = @transform_1, window_bounds = array<i64: 128, 128>}, {pipeline_mode = #tpu.pipeline_mode<synchronous>, transform_indices = @transform_2, window_bounds = array<i64: 1, 128>}, {pipeline_mode = #tpu.pipeline_mode<synchronous>, transform_indices = @transform_3, window_bounds = array<i64: 128, 128>}, {pipeline_mode = #tpu.pipeline_mode<synchronous>, transform_indices = @transform_4, window_bounds = array<i64: 1, 128>}, {pipeline_mode = #tpu.pipeline_mode<synchronous>, transform_indices = @transform_5, window_bounds = array<i64: 128, 128>}, {pipeline_mode = #tpu.pipeline_mode<synchronous>, transform_indices = @transform_6, window_bounds = array<i64: 1, 128>}, {pipeline_mode = #tpu.pipeline_mode<synchronous>, transform_indices = @transform_7, window_bounds = array<i64: 128, 128>}, {pipeline_mode = #tpu.pipeline_mode<synchronous>, transform_indices = @transform_8, window_bounds = array<i64: 1, 128>}, {transform_indices = @transform_9, window_bounds = array<i64: 8, 128>}, {transform_indices = @transform_10, window_bounds = array<i64: 8, 128>}]} {
    %c0 = arith.constant 0 : index
    %c0_0 = arith.constant 0 : index
    %0 = vector.load %arg1[%c0, %c0_0] : memref<8x128xf32, #tpu.memory_space<vmem>>, vector<8x128xf32>
    %c0_1 = arith.constant 0 : index
    %c0_2 = arith.constant 0 : index
    %1 = vector.load %arg2[%c0_1, %c0_2] : memref<128x128xf32, #tpu.memory_space<vmem>>, vector<128x128xf32>
    %cst = arith.constant dense<0.000000e+00> : vector<8x128xf32>
    %2 = tpu.matmul %0, %1, %cst {dimension_numbers = #tpu.dot_dimension_numbers<[1], [0], [0], [1], [0, 0, 1, 1], [], []>} : vector<8x128xf32>, vector<128x128xf32>, vector<8x128xf32> -> vector<8x128xf32>
    %c0_3 = arith.constant 0 : index
    %c0_4 = arith.constant 0 : index
    %3 = vector.load %arg3[%c0_3, %c0_4] : memref<1x128xf32, #tpu.memory_space<vmem>>, vector<1x128xf32>
    %4 = vector.broadcast %3 : vector<1x128xf32> to vector<8x128xf32>
    %5 = arith.addf %2, %4 : vector<8x128xf32>
    %cst_5 = arith.constant 0.000000e+00 : f32
    %6 = vector.broadcast %cst_5 : f32 to vector<8x128xf32>
    %7 = arith.maximumf %5, %6 : vector<8x128xf32>
    %c0_6 = arith.constant 0 : index
    %c0_7 = arith.constant 0 : index
    %8 = vector.load %arg4[%c0_6, %c0_7] : memref<128x128xf32, #tpu.memory_space<vmem>>, vector<128x128xf32>
    %cst_8 = arith.constant dense<0.000000e+00> : vector<8x128xf32>
    %9 = tpu.matmul %7, %8, %cst_8 {dimension_numbers = #tpu.dot_dimension_numbers<[1], [0], [0], [1], [0, 0, 1, 1], [], []>} : vector<8x128xf32>, vector<128x128xf32>, vector<8x128xf32> -> vector<8x128xf32>
    %c0_9 = arith.constant 0 : index
    %c0_10 = arith.constant 0 : index
    %10 = vector.load %arg5[%c0_9, %c0_10] : memref<1x128xf32, #tpu.memory_space<vmem>>, vector<1x128xf32>
    %11 = vector.broadcast %10 : vector<1x128xf32> to vector<8x128xf32>
    %12 = arith.addf %9, %11 : vector<8x128xf32>
    %c0_11 = arith.constant 0 : index
    %c0_12 = arith.constant 0 : index
    %13 = vector.load %arg10[%c0_11, %c0_12] : memref<8x128xf32, #tpu.memory_space<vmem>>, vector<8x128xf32>
    tpu.vector_store %arg10[%c0_11, %c0_12], %12 {strides = array<i32>} : memref<8x128xf32, #tpu.memory_space<vmem>>, vector<8x128xf32>,
    %c0_13 = arith.constant 0 : index
    %c0_14 = arith.constant 0 : index
    %14 = vector.load %arg6[%c0_13, %c0_14] : memref<128x128xf32, #tpu.memory_space<vmem>>, vector<128x128xf32>
    %cst_15 = arith.constant dense<0.000000e+00> : vector<8x128xf32>
    %15 = tpu.matmul %12, %14, %cst_15 {dimension_numbers = #tpu.dot_dimension_numbers<[1], [0], [0], [1], [0, 0, 1, 1], [], []>} : vector<8x128xf32>, vector<128x128xf32>, vector<8x128xf32> -> vector<8x128xf32>
    %c0_16 = arith.constant 0 : index
    %c0_17 = arith.constant 0 : index
    %16 = vector.load %arg7[%c0_16, %c0_17] : memref<1x128xf32, #tpu.memory_space<vmem>>, vector<1x128xf32>
    %17 = vector.broadcast %16 : vector<1x128xf32> to vector<8x128xf32>
    %18 = arith.addf %15, %17 : vector<8x128xf32>
    %cst_18 = arith.constant 0.000000e+00 : f32
    %19 = vector.broadcast %cst_18 : f32 to vector<8x128xf32>
    %20 = arith.maximumf %18, %19 : vector<8x128xf32>
    %c0_19 = arith.constant 0 : index
    %c0_20 = arith.constant 0 : index
    %21 = vector.load %arg8[%c0_19, %c0_20] : memref<128x128xf32, #tpu.memory_space<vmem>>, vector<128x128xf32>
    %cst_21 = arith.constant dense<0.000000e+00> : vector<8x128xf32>
    %22 = tpu.matmul %20, %21, %cst_21 {dimension_numbers = #tpu.dot_dimension_numbers<[1], [0], [0], [1], [0, 0, 1, 1], [], []>} : vector<8x128xf32>, vector<128x128xf32>, vector<8x128xf32> -> vector<8x128xf32>
    %c0_22 = arith.constant 0 : index
    %c0_23 = arith.constant 0 : index
    %23 = vector.load %arg9[%c0_22, %c0_23] : memref<1x128xf32, #tpu.memory_space<vmem>>, vector<1x128xf32>
    %24 = vector.broadcast %23 : vector<1x128xf32> to vector<8x128xf32>
    %25 = arith.addf %22, %24 : vector<8x128xf32>
    %c0_24 = arith.constant 0 : index
    %c0_25 = arith.constant 0 : index
    %26 = vector.load %arg11[%c0_24, %c0_25] : memref<8x128xf32, #tpu.memory_space<vmem>>, vector<8x128xf32>
    tpu.vector_store %arg11[%c0_24, %c0_25], %25 {strides = array<i32>} : memref<8x128xf32, #tpu.memory_space<vmem>>, vector<8x128xf32>,
    return
  }
  func.func @transform_0(%arg0: i32) -> (i32, i32) {
    %c0_i32 = arith.constant 0 : i32
    %c0_i32_0 = arith.constant 0 : i32
    return %arg0, %c0_i32 : i32, i32
  }
  func.func @transform_1(%arg0: i32) -> (i32, i32) {
    %c0_i32 = arith.constant 0 : i32
    %c0_i32_0 = arith.constant 0 : i32
    %c0_i32_1 = arith.constant 0 : i32
    return %c0_i32, %c0_i32_0 : i32, i32
  }
  func.func @transform_2(%arg0: i32) -> (i32, i32) {
    %c0_i32 = arith.constant 0 : i32
    %c0_i32_0 = arith.constant 0 : i32
    %c0_i32_1 = arith.constant 0 : i32
    return %c0_i32, %c0_i32_0 : i32, i32
  }
  func.func @transform_3(%arg0: i32) -> (i32, i32) {
    %c0_i32 = arith.constant 0 : i32
    %c0_i32_0 = arith.constant 0 : i32
    %c0_i32_1 = arith.constant 0 : i32
    return %c0_i32, %c0_i32_0 : i32, i32
  }
  func.func @transform_4(%arg0: i32) -> (i32, i32) {
    %c0_i32 = arith.constant 0 : i32
    %c0_i32_0 = arith.constant 0 : i32
    %c0_i32_1 = arith.constant 0 : i32
    return %c0_i32, %c0_i32_0 : i32, i32
  }
  func.func @transform_5(%arg0: i32) -> (i32, i32) {
    %c0_i32 = arith.constant 0 : i32
    %c0_i32_0 = arith.constant 0 : i32
    %c0_i32_1 = arith.constant 0 : i32
    return %c0_i32, %c0_i32_0 : i32, i32
  }
  func.func @transform_6(%arg0: i32) -> (i32, i32) {
    %c0_i32 = arith.constant 0 : i32
    %c0_i32_0 = arith.constant 0 : i32
    %c0_i32_1 = arith.constant 0 : i32
    return %c0_i32, %c0_i32_0 : i32, i32
  }
  func.func @transform_7(%arg0: i32) -> (i32, i32) {
    %c0_i32 = arith.constant 0 : i32
    %c0_i32_0 = arith.constant 0 : i32
    %c0_i32_1 = arith.constant 0 : i32
    return %c0_i32, %c0_i32_0 : i32, i32
  }
  func.func @transform_8(%arg0: i32) -> (i32, i32) {
    %c0_i32 = arith.constant 0 : i32
    %c0_i32_0 = arith.constant 0 : i32
    %c0_i32_1 = arith.constant 0 : i32
    return %c0_i32, %c0_i32_0 : i32, i32
  }
  func.func @transform_9(%arg0: i32) -> (i32, i32) {
    %c0_i32 = arith.constant 0 : i32
    %c0_i32_0 = arith.constant 0 : i32
    return %arg0, %c0_i32 : i32, i32
  }
  func.func @transform_10(%arg0: i32) -> (i32, i32) {
    %c0_i32 = arith.constant 0 : i32
    %c0_i32_0 = arith.constant 0 : i32
    return %arg0, %c0_i32 : i32, i32
  }
}

</mosaic_0001>

<bundles_post_ra>
// kernel: basic_autoencoder_forward.1
= control target key start
LH: loop header
LB: loop body
LE: loop exit
PB: predicated region body
PF: predicated region fallthrough
CT: control target
= control target key end

     0   :  { %16 = vsyncpa [#allocation3], 0  ;;  %s1179_s0 = inlined_call_operand.vmem [shape: f32[8,128], index: 0, kind: input, shape index: {}]   ;;  %s1180_s1 = inlined_call_operand.hbm [shape: f32[128,128], index: 1, kind: input, shape index: {}]   ;;  %s1181_s2 = inlined_call_operand.vmem [shape: f32[1,128], index: 2, kind: input, shape index: {}]   ;;  %s1182_s3 = inlined_call_operand.hbm [shape: f32[128,128], index: 3, kind: input, shape index: {}]   ;;  %s1183_s4 = inlined_call_operand.vmem [shape: f32[1,128], index: 4, kind: input, shape index: {}]   ;;  %s1184_s5 = inlined_call_operand.hbm [shape: f32[128,128], index: 5, kind: input, shape index: {}]   ;;  %s1185_s6 = inlined_call_operand.vmem [shape: f32[1,128], index: 6, kind: input, shape index: {}]   ;;  %s1186_s7 = inlined_call_operand.hbm [shape: f32[128,128], index: 7, kind: input, shape index: {}]   ;;  %s1187_s8 = inlined_call_operand.vmem [shape: f32[1,128], index: 8, kind: input, shape index: {}]   ;;  %s1188_s9 = inlined_call_operand.hbm [shape: f32[8,128], index: 9, kind: output, shape index: {0}]   ;;  %s1189_s10 = inlined_call_operand.hbm [shape: f32[8,128], index: 10, kind: output, shape index: {1}]  }
   0x1   :  { %17 = vsyncpa [#allocation6], 0 }
   0x2   :  { %18 = vsyncpa [#allocation9], 0 }
   0x3   :  { %19 = vsyncpa [#allocation4], 0 }
   0x4   :  { %20 = vsyncpa [#allocation12], 0  ;;  %s960_s13 = smov [#allocation5]   ;;  %s961_s15 = smov [#allocation2]  }
   0x5   :  { %s42_s14 = sshll.u32 %s960_s13, 4  ;;  %s28_s16 = sshll.u32 %s961_s15, 4  ;;  %s43_s14 = int_to_ptr.vmem [resolvable:$true] %s42_s14  ;;  %s1026_s16 = int_to_ptr.vmem [resolvable:$true] %s28_s16 }
   0x6   :  { %s818_s19 = scalar_lea.hbm %s1182_s3, 2048 }
   0x7   :  { %p819_p0 = scmp.ne.s32.totalorder %s1182_s3, %s818_s19  ;;  %p822_p1 = scmp.lt.u32.totalorder %s818_s19, %s1182_s3 }
   0x9   :  { %p824_p2 = pnand %p822_p1, %p819_p0 }
   0xb   :  { %827 = shalt.err (!%p824_p2)
}
   0xc   :  { %s828_s24 = scalar_lea.vmem %s43_s14, 2048  ;;  %p833_p4 = scmp.lt.s32.totalorder %s43_s14, %s43_s14 }
   0xd   :  { %p829_p3 = scmp.ne.s32.totalorder %s43_s14, %s828_s24  ;;  %p834_p5 = scmp.lt.s32.totalorder %s828_s24, %s828_s24 }
   0xf   :  { %p835_p6 = por %p834_p5, %p833_p4 }
  0x11   :  { %p836_p7 = pnand %p835_p6, %p829_p3 }
  0x13   :  { %839 = shalt.err (!%p836_p7)
}
  0x14   :  { %s962_s25 = smov 128   ;;  %s963_s26 = smov 8  }
  0x15   :  { %48 = dma.hbm_to_vmem [thread:$0]  %s1182_s3, 2048, %s43_s14, [#allocation6], %s962_s25, %s962_s25, %s963_s26  }
  0x16   :  { %s840_s11 = scalar_lea.hbm %s1180_s1, 2048 }
  0x17   :  { %p841_p8 = scmp.ne.s32.totalorder %s1180_s1, %s840_s11  ;;  %p844_p9 = scmp.lt.u32.totalorder %s840_s11, %s1180_s1 }
  0x19   :  { %p846_p10 = pnand %p844_p9, %p841_p8 }
  0x1b   :  { %849 = shalt.err (!%p846_p10)
}
  0x1c   :  { %s850_s18 = scalar_lea.vmem %s1026_s16, 2048  ;;  %p855_p12 = scmp.lt.s32.totalorder %s1026_s16, %s1026_s16 }
  0x1d   :  { %p851_p11 = scmp.ne.s32.totalorder %s1026_s16, %s850_s18  ;;  %p856_p13 = scmp.lt.s32.totalorder %s850_s18, %s850_s18 }
  0x1f   :  { %p857_p0 = por %p856_p13, %p855_p12 }
  0x21   :  { %p858_p1 = pnand %p857_p0, %p851_p11 }
  0x23   :  { %861 = shalt.err (!%p858_p1)
}
  0x24   :  { %34 = dma.hbm_to_vmem [thread:$0]  %s1180_s1, 2048, %s1026_s16, [#allocation3], %s962_s25, %s962_s25, %s963_s26  }
  0x25   :  { %s964_s19 = smov [#allocation7]   ;;  %s965_s21 = smov [#allocation8]  }
  0x26   :  { %s56_s20 = sshll.u32 %s964_s19, 4  ;;  %s70_s22 = sshll.u32 %s965_s21, 4  ;;  %s57_s20 = int_to_ptr.vmem [resolvable:$true] %s56_s20  ;;  %s1063_s22 = int_to_ptr.vmem [resolvable:$true] %s70_s22 }
  0x27   :  { %s862_s27 = scalar_lea.hbm %s1184_s5, 2048 }
  0x28   :  { %p863_p2 = scmp.ne.s32.totalorder %s1184_s5, %s862_s27  ;;  %p866_p3 = scmp.lt.u32.totalorder %s862_s27, %s1184_s5 }
  0x2a   :  { %p868_p4 = pnand %p866_p3, %p863_p2 }
  0x2c   :  { %871 = shalt.err (!%p868_p4)
}
  0x2d   :  { %s872_s1 = scalar_lea.vmem %s57_s20, 2048  ;;  %p877_p6 = scmp.lt.s32.totalorder %s57_s20, %s57_s20 }
  0x2e   :  { %p873_p5 = scmp.ne.s32.totalorder %s57_s20, %s872_s1  ;;  %p878_p7 = scmp.lt.s32.totalorder %s872_s1, %s872_s1 }
  0x30   :  { %p879_p8 = por %p878_p7, %p877_p6 }
  0x32   :  { %p880_p9 = pnand %p879_p8, %p873_p5 }
  0x34   :  { %883 = shalt.err (!%p880_p9)
}
  0x35   :  { %62 = dma.hbm_to_vmem [thread:$0]  %s1184_s5, 2048, %s57_s20, [#allocation6], %s962_s25, %s962_s25, %s963_s26  }
  0x36   :  { %s884_s17 = scalar_lea.hbm %s1186_s7, 2048 }
  0x37   :  { %p885_p10 = scmp.ne.s32.totalorder %s1186_s7, %s884_s17  ;;  %p888_p11 = scmp.lt.u32.totalorder %s884_s17, %s1186_s7 }
  0x39   :  { %p890_p12 = pnand %p888_p11, %p885_p10 }
  0x3b   :  { %893 = shalt.err (!%p890_p12)
}
  0x3c   :  { %s894_s21 = scalar_lea.vmem %s1063_s22, 2048  ;;  %p899_p0 = scmp.lt.s32.totalorder %s1063_s22, %s1063_s22 }
  0x3d   :  { %p895_p13 = scmp.ne.s32.totalorder %s1063_s22, %s894_s21  ;;  %p900_p1 = scmp.lt.s32.totalorder %s894_s21, %s894_s21 }
  0x3f   :  { %p901_p2 = por %p900_p1, %p899_p0 }
  0x41   :  { %p902_p3 = pnand %p901_p2, %p895_p13 }
  0x43   :  { %905 = shalt.err (!%p902_p3)
}
  0x44   :  { %76 = dma.hbm_to_vmem [thread:$0]  %s1186_s7, 2048, %s1063_s22, [#allocation9], %s962_s25, %s962_s25, %s963_s26  }
  0x45   :  { %950 = dma.done.wait [#allocation3], 2048  }
  0x46   :  { %951 = vsyncadd [#allocation3], 4294965248 }
  0x47   :  { %952 = dma.done.wait [#allocation6], 4096  }
  0x48   :  { %953 = vsyncadd [#allocation6], 4294963200 }
  0x49   :  { %954 = dma.done.wait [#allocation9], 2048  }
  0x4a   :  { %955 = vsyncadd [#allocation9], 4294965248  ;;  %v966_v0 = vmov 0.0|0.0   ;;  %vm967_vm0 = vmmov 0   ;;  %v968_v1 = vmov 0.0   ;;  %v92_v2 = vld [vmem:[#allocation2] sm:$0xff] }
  0x4b   :  { %711 = vmatprep.subr.bf16.mxu0 %v966_v0  ;;  %603 = vmatprep.mubr.msk.f32.mxu0 %vm967_vm0, %v968_v1  ;;  %v93_v3 = vld [vmem:[#allocation2 + $0x8] sm:$0xff]  ;;  %v94_v4 = vld [vmem:[#allocation2 + $0x10] sm:$0xff]  ;;  %v95_v6 = vld [vmem:[#allocation2 + $0x18] sm:$0xff]  ;;  %s969_s27 = smov [#allocation10]  }
  0x4c   :  { %735 = vmatprep.subr.bf16.mxu1 %v966_v0  ;;  %638 = vmatprep.mubr.msk.f32.mxu1 %vm967_vm0, %v968_v1  ;;  %v712_v5 = vpack.c.bf16 %v93_v3, %v92_v2  ;;  %v715_v7 = vpack.c.bf16 %v95_v6, %v94_v4  ;;  %v96_v8 = vld [vmem:[#allocation2 + $0x20] sm:$0xff]  ;;  %v97_v9 = vld [vmem:[#allocation2 + $0x28] sm:$0xff]  ;;  %v188_v12 = vld [vmem:[#allocation5 + $0x10] sm:$0xff] }
  0x4d   :  { %v186_v10 = vld [vmem:[#allocation5] sm:$0xff]  ;;  %v187_v11 = vld [vmem:[#allocation5 + $0x8] sm:$0xff]  ;;  %v189_v13 = vld [vmem:[#allocation5 + $0x18] sm:$0xff]  ;;  %v718_v14 = vpack.c.bf16 %v97_v9, %v96_v8 }
  0x4e   :  { %713 = vmatpush3.bf16.msra.mxu0 %v712_v5  ;;  %v736_v15 = vpack.c.bf16 %v187_v11, %v186_v10  ;;  %v98_v16 = vld [vmem:[#allocation2 + $0x30] sm:$0xff]  ;;  %v99_v17 = vld [vmem:[#allocation2 + $0x38] sm:$0xff]  ;;  %v739_v18 = vpack.c.bf16 %v189_v13, %v188_v12  ;;  %v190_v19 = vld [vmem:[#allocation5 + $0x20] sm:$0xff] }
  0x4f   :  { %714 = vmatprep.subr.bf16.mxu0 %v966_v0  ;;  %v191_v20 = vld [vmem:[#allocation5 + $0x28] sm:$0xff]  ;;  %v721_v21 = vpack.c.bf16 %v99_v17, %v98_v16  ;;  %v100_v22 = vld [vmem:[#allocation2 + $0x40] sm:$0xff]  ;;  %v192_v25 = vld [vmem:[#allocation5 + $0x30] sm:$0xff] }
  0x50   :  { %737 = vmatpush3.bf16.msra.mxu1 %v736_v15  ;;  %v101_v23 = vld [vmem:[#allocation2 + $0x48] sm:$0xff]  ;;  %v742_v24 = vpack.c.bf16 %v191_v20, %v190_v19  ;;  %v193_v26 = vld [vmem:[#allocation5 + $0x38] sm:$0xff]  ;;  %v102_v28 = vld [vmem:[#allocation2 + $0x50] sm:$0xff] }
  0x51   :  { %738 = vmatprep.subr.bf16.mxu1 %v966_v0  ;;  %v724_v27 = vpack.c.bf16 %v101_v23, %v100_v22  ;;  %v103_v29 = vld [vmem:[#allocation2 + $0x58] sm:$0xff]  ;;  %v745_v30 = vpack.c.bf16 %v193_v26, %v192_v25  ;;  %v194_v31 = vld [vmem:[#allocation5 + $0x40] sm:$0xff]  ;;  %v195_v32 = vld [vmem:[#allocation5 + $0x48] sm:$0xff] }
  0x52   :  { %716 = vmatpush3.bf16.msra.mxu0 %v715_v7  ;;  %v727_v33 = vpack.c.bf16 %v103_v29, %v102_v28  ;;  %v104_v34 = vld [vmem:[#allocation2 + $0x60] sm:$0xff]  ;;  %v105_v35 = vld [vmem:[#allocation2 + $0x68] sm:$0xff]  ;;  %v748_v36 = vpack.c.bf16 %v195_v32, %v194_v31  ;;  %v196_v37 = vld [vmem:[#allocation5 + $0x50] sm:$0xff] }
  0x53   :  { %717 = vmatprep.subr.bf16.mxu0 %v966_v0  ;;  %v197_v38 = vld [vmem:[#allocation5 + $0x58] sm:$0xff]  ;;  %v730_v39 = vpack.c.bf16 %v105_v35, %v104_v34  ;;  %v106_v40 = vld [vmem:[#allocation2 + $0x70] sm:$0xff]  ;;  %v198_v43 = vld [vmem:[#allocation5 + $0x60] sm:$0xff] }
  0x54   :  { %740 = vmatpush3.bf16.msra.mxu1 %v739_v18  ;;  %v107_v41 = vld [vmem:[#allocation2 + $0x78] sm:$0xff]  ;;  %v751_v42 = vpack.c.bf16 %v197_v38, %v196_v37  ;;  %v199_v44 = vld [vmem:[#allocation5 + $0x68] sm:$0xff]  ;;  %v91_v47 = vld [vmem:[%s1179_s0] sm:$0xff] }
  0x55   :  { %741 = vmatprep.subr.bf16.mxu1 %v966_v0  ;;  %v733_v45 = vpack.c.bf16 %v107_v41, %v106_v40  ;;  %v754_v46 = vpack.c.bf16 %v199_v44, %v198_v43  ;;  %v200_v48 = vld [vmem:[#allocation5 + $0x70] sm:$0xff]  ;;  %v201_v49 = vld [vmem:[#allocation5 + $0x78] sm:$0xff]  ;;  %v280_v51 = vld [vmem:[#allocation7] sm:$0xff] }
  0x56   :  { %719 = vmatpush3.bf16.msra.mxu0 %v718_v14  ;;  %v757_v50 = vpack.c.bf16 %v201_v49, %v200_v48  ;;  %v281_v52 = vld [vmem:[#allocation7 + $0x8] sm:$0xff]  ;;  %v282_v53 = vld [vmem:[#allocation7 + $0x10] sm:$0xff]  ;;  %v283_v55 = vld [vmem:[#allocation7 + $0x18] sm:$0xff] }
  0x57   :  { %720 = vmatprep.subr.bf16.mxu0 %v966_v0  ;;  %v760_v54 = vpack.c.bf16 %v281_v52, %v280_v51  ;;  %v763_v56 = vpack.c.bf16 %v283_v55, %v282_v53  ;;  %v284_v57 = vld [vmem:[#allocation7 + $0x20] sm:$0xff]  ;;  %v285_v58 = vld [vmem:[#allocation7 + $0x28] sm:$0xff]  ;;  %v286_v60 = vld [vmem:[#allocation7 + $0x30] sm:$0xff] }
  0x58   :  { %743 = vmatpush3.bf16.msra.mxu1 %v742_v24  ;;  %v766_v59 = vpack.c.bf16 %v285_v58, %v284_v57  ;;  %v287_v61 = vld [vmem:[#allocation7 + $0x38] sm:$0xff]  ;;  %v288_v63 = vld [vmem:[#allocation7 + $0x40] sm:$0xff]  ;;  %v289_v2 = vld [vmem:[#allocation7 + $0x48] sm:$0xff] }
  0x59   :  { %744 = vmatprep.subr.bf16.mxu1 %v966_v0  ;;  %v769_v62 = vpack.c.bf16 %v287_v61, %v286_v60  ;;  %v772_v3 = vpack.c.bf16 %v289_v2, %v288_v63  ;;  %v290_v4 = vld [vmem:[#allocation7 + $0x50] sm:$0xff]  ;;  %v291_v5 = vld [vmem:[#allocation7 + $0x58] sm:$0xff]  ;;  %v292_v7 = vld [vmem:[#allocation7 + $0x60] sm:$0xff] }
  0x5a   :  { %722 = vmatpush3.bf16.msra.mxu0 %v721_v21  ;;  %v775_v6 = vpack.c.bf16 %v291_v5, %v290_v4  ;;  %v293_v8 = vld [vmem:[#allocation7 + $0x68] sm:$0xff]  ;;  %v499_v10 = vld [vmem:[%s1181_s2] ss:$0 sm:$0xff]  ;;  %v294_v15 = vld [vmem:[#allocation7 + $0x70] sm:$0xff] }
  0x5b   :  { %723 = vmatprep.subr.bf16.mxu0 %v966_v0  ;;  %v778_v9 = vpack.c.bf16 %v293_v8, %v292_v7  ;;  %v295_v16 = vld [vmem:[#allocation7 + $0x78] sm:$0xff]  ;;  %v374_v18 = vld [vmem:[#allocation8] sm:$0xff]  ;;  %v375_v19 = vld [vmem:[#allocation8 + $0x8] sm:$0xff] }
  0x5c   :  { %746 = vmatpush3.bf16.msra.mxu1 %v745_v30  ;;  %v781_v17 = vpack.c.bf16 %v295_v16, %v294_v15  ;;  %v376_v20 = vld [vmem:[#allocation8 + $0x10] sm:$0xff]  ;;  %v784_v21 = vpack.c.bf16 %v375_v19, %v374_v18  ;;  %v377_v22 = vld [vmem:[#allocation8 + $0x18] sm:$0xff]  ;;  %v378_v24 = vld [vmem:[#allocation8 + $0x20] sm:$0xff] }
  0x5d   :  { %747 = vmatprep.subr.bf16.mxu1 %v966_v0  ;;  %v787_v23 = vpack.c.bf16 %v377_v22, %v376_v20  ;;  %v379_v25 = vld [vmem:[#allocation8 + $0x28] sm:$0xff]  ;;  %v382_v29 = vld [vmem:[#allocation8 + $0x40] sm:$0xff]  ;;  %v384_v32 = vld [vmem:[#allocation8 + $0x50] sm:$0xff] }
  0x5e   :  { %725 = vmatpush3.bf16.msra.mxu0 %v724_v27  ;;  %v790_v26 = vpack.c.bf16 %v379_v25, %v378_v24  ;;  %v381_v27 = vld [vmem:[#allocation8 + $0x38] sm:$0xff]  ;;  %v383_v30 = vld [vmem:[#allocation8 + $0x48] sm:$0xff]  ;;  %v386_v35 = vld [vmem:[#allocation8 + $0x60] sm:$0xff] }
  0x5f   :  { %726 = vmatprep.subr.bf16.mxu0 %v966_v0  ;;  %v796_v31 = vpack.c.bf16 %v383_v30, %v382_v29  ;;  %v500_v38 = vld [vmem:[%s1183_s4] ss:$0 sm:$0xff]  ;;  %v389_v43 = vld [vmem:[#allocation8 + $0x78] sm:$0xff]  ;;  %s474_s4 = sshll.u32 %s969_s27, 4  ;;  %s475_s4 = int_to_ptr.vmem [resolvable:$true] %s474_s4 }
  0x60   :  { %749 = vmatpush3.bf16.msra.mxu1 %v748_v36  ;;  %v387_v36 = vld [vmem:[#allocation8 + $0x68] sm:$0xff]  ;;  %s906_s28 = scalar_lea.vmem %s475_s4, 128  ;;  %p911_p5 = scmp.lt.s32.totalorder %s475_s4, %s475_s4 }
  0x61   :  { %750 = vmatprep.subr.bf16.mxu1 %v966_v0  ;;  %v802_v37 = vpack.c.bf16 %v387_v36, %v386_v35  ;;  %p907_p4 = scmp.ne.s32.totalorder %s475_s4, %s906_s28  ;;  %p912_p6 = scmp.lt.s32.totalorder %s906_s28, %s906_s28 }
  0x62   :  { %728 = vmatpush3.bf16.msra.mxu0 %v727_v33  ;;  %v385_v33 = vld [vmem:[#allocation8 + $0x58] sm:$0xff] }
  0x63   :  { %729 = vmatprep.subr.bf16.mxu0 %v966_v0  ;;  %v799_v34 = vpack.c.bf16 %v385_v33, %v384_v32  ;;  %p913_p7 = por %p912_p6, %p911_p5 }
  0x64   :  { %752 = vmatpush3.bf16.msra.mxu1 %v751_v42  ;;  %v388_v42 = vld [vmem:[#allocation8 + $0x70] sm:$0xff] }
  0x65   :  { %753 = vmatprep.subr.bf16.mxu1 %v966_v0  ;;  %v805_v44 = vpack.c.bf16 %v389_v43, %v388_v42  ;;  %p914_p8 = pnand %p913_p7, %p907_p4 }
  0x66   :  { %731 = vmatpush3.bf16.msra.mxu0 %v730_v39 }
  0x67   :  { %732 = vmatprep.subr.bf16.mxu0 %v966_v0 }
  0x68   :  { %755 = vmatpush3.bf16.msra.mxu1 %v754_v46 }
  0x69   :  { %756 = vmatprep.subr.bf16.mxu1 %v966_v0 }
  0x6a   :  { %734 = vmatpush3.bf16.msra.mxu0 %v733_v45  ;;  %v501_v45 = vld [vmem:[%s1185_s6] ss:$0 sm:$0xff] }
  0x6b   :  { %759 = vmatprep.subr.bf16.mxu0 %v966_v0 }
  0x6c   :  { %758 = vmatpush3.bf16.msra.mxu1 %v757_v50 }
  0x6d   :  { %604 = vmatmul.mubr.f32.vlgmr.msra.gmra.mrb[0].mxu0 %v91_v47  ;;  %783 = vmatprep.subr.bf16.mxu1 %v966_v0 }
  0x6e   :  { %673 = vmatprep.mubr.msk.f32.mxu0 %vm967_vm0, %v968_v1  ;;  %761 = vmatpush3.bf16.msra.mxu0 %v760_v54 }
  0x6f   :  { %762 = vmatprep.subr.bf16.mxu0 %v966_v0 }
  0x72   :  { %764 = vmatpush3.bf16.msra.mxu0 %v763_v56 }
  0x73   :  { %765 = vmatprep.subr.bf16.mxu0 %v966_v0 }
  0x76   :  { %767 = vmatpush3.bf16.msra.mxu0 %v766_v59 }
  0x77   :  { %768 = vmatprep.subr.bf16.mxu0 %v966_v0 }
  0x7a   :  { %770 = vmatpush3.bf16.msra.mxu0 %v769_v62 }
  0x7b   :  { %771 = vmatprep.subr.bf16.mxu0 %v966_v0 }
  0x7e   :  { %773 = vmatpush3.bf16.msra.mxu0 %v772_v3 }
  0x7f   :  { %774 = vmatprep.subr.bf16.mxu0 %v966_v0 }
  0x82   :  { %776 = vmatpush3.bf16.msra.mxu0 %v775_v6 }
  0x83   :  { %777 = vmatprep.subr.bf16.mxu0 %v966_v0 }
  0x86   :  { %779 = vmatpush3.bf16.msra.mxu0 %v778_v9 }
  0x87   :  { %780 = vmatprep.subr.bf16.mxu0 %v966_v0 }
  0x8a   :  { %782 = vmatpush3.bf16.msra.mxu0 %v781_v17 }
 0x140   :  { %v181_v11 = vpop.f32.mrb[0].mxu0 }
 0x141   :  { %v182_v12 = vadd.f32 %v499_v10, %v181_v11  ;;  %v605_v13 = vpop.f32.mrb[1].mxu0 }
 0x143   :  { %v185_v14 = vmax.f32 %v182_v12, 0.0 }
 0x145   :  { %639 = vmatmul.mubr.f32.vlgmr.msra.gmra.mrb[0].mxu1 %v185_v14 }
 0x146   :  { %708 = vmatprep.mubr.msk.f32.mxu1 %vm967_vm0, %v968_v1  ;;  %785 = vmatpush3.bf16.msra.mxu1 %v784_v21  ;;  %v380_v1 = vld [vmem:[#allocation8 + $0x30] sm:$0xff] }
 0x147   :  { %786 = vmatprep.subr.bf16.mxu1 %v966_v0  ;;  %v793_v28 = vpack.c.bf16 %v381_v27, %v380_v1 }
 0x14a   :  { %788 = vmatpush3.bf16.msra.mxu1 %v787_v23 }
 0x14b   :  { %789 = vmatprep.subr.bf16.mxu1 %v966_v0 }
 0x14e   :  { %791 = vmatpush3.bf16.msra.mxu1 %v790_v26 }
 0x14f   :  { %792 = vmatprep.subr.bf16.mxu1 %v966_v0 }
 0x152   :  { %794 = vmatpush3.bf16.msra.mxu1 %v793_v28 }
 0x153   :  { %795 = vmatprep.subr.bf16.mxu1 %v966_v0 }
 0x156   :  { %797 = vmatpush3.bf16.msra.mxu1 %v796_v31 }
 0x157   :  { %798 = vmatprep.subr.bf16.mxu1 %v966_v0 }
 0x15a   :  { %800 = vmatpush3.bf16.msra.mxu1 %v799_v34 }
 0x15b   :  { %801 = vmatprep.subr.bf16.mxu1 %v966_v0 }
 0x15e   :  { %803 = vmatpush3.bf16.msra.mxu1 %v802_v37 }
 0x15f   :  { %804 = vmatprep.subr.bf16.mxu1 %v966_v0 }
 0x162   :  { %806 = vmatpush3.bf16.msra.mxu1 %v805_v44 }
 0x218   :  { %v275_v39 = vpop.f32.mrb[0].mxu1 }
 0x219   :  { %v276_v40 = vadd.f32 %v500_v38, %v275_v39  ;;  %v640_v41 = vpop.f32.mrb[1].mxu1 }
 0x21b   :  { %279 = vst [vmem:[#allocation10] sm:$0xff] %v276_v40  ;;  %674 = vmatmul.mubr.f32.vlgmr.msra.gmra.mrb[2].mxu0 %v276_v40 }
 0x2ee   :  { %v369_v46 = vpop.f32.mrb[2].mxu0 }
 0x2ef   :  { %v370_v47 = vadd.f32 %v501_v45, %v369_v46  ;;  %v675_v0 = vpop.f32.mrb[3].mxu0 }
 0x2f1   :  { %v373_v48 = vmax.f32 %v370_v47, 0.0 }
 0x2f3   :  { %709 = vmatmul.mubr.f32.vlgmr.msra.gmra.mrb[2].mxu1 %v373_v48 }
 0x2f4   :  { %917 = shalt.err (!%p914_p8)
}
 0x2f5   :  { %s918_s11 = scalar_lea.hbm %s1188_s9, 128 }
 0x2f6   :  { %p919_p9 = scmp.ne.s32.totalorder %s1188_s9, %s918_s11  ;;  %p922_p10 = scmp.lt.u32.totalorder %s918_s11, %s1188_s9 }
 0x2f8   :  { %p924_p11 = pnand %p922_p10, %p919_p9 }
 0x2fa   :  { %927 = shalt.err (!%p924_p11)
}
 0x2fb   :  { %477 = dma.vmem_to_hbm [thread:$0]  %s475_s4, 128, %s1188_s9, [#allocation4]   ;;  %v502_v49 = vld [vmem:[%s1187_s8] ss:$0 sm:$0xff] }
 0x2fc   :  { %s970_s3 = smov [#allocation11]  }
 0x2fd   :  { %s484_s14 = sshll.u32 %s970_s3, 4  ;;  %s485_s14 = int_to_ptr.vmem [resolvable:$true] %s484_s14 }
 0x2fe   :  { %s928_s19 = scalar_lea.vmem %s485_s14, 128  ;;  %p933_p13 = scmp.lt.s32.totalorder %s485_s14, %s485_s14 }
 0x2ff   :  { %p929_p12 = scmp.ne.s32.totalorder %s485_s14, %s928_s19  ;;  %p934_p0 = scmp.lt.s32.totalorder %s928_s19, %s928_s19 }
 0x301   :  { %p935_p1 = por %p934_p0, %p933_p13 }
 0x303   :  { %p936_p2 = pnand %p935_p1, %p929_p12 }
 0x3c6   :  { %v463_v50 = vpop.f32.mrb[2].mxu1 }
 0x3c7   :  { %v464_v51 = vadd.f32 %v502_v49, %v463_v50  ;;  %v710_v52 = vpop.f32.mrb[3].mxu1 }
 0x3c9   :  { %467 = vst [vmem:[#allocation11] sm:$0xff] %v464_v51 }
 0x3ca   :  { %939 = shalt.err (!%p936_p2)
}
 0x3cb   :  { %s940_s5 = scalar_lea.hbm %s1189_s10, 128 }
 0x3cc   :  { %p941_p3 = scmp.ne.s32.totalorder %s1189_s10, %s940_s5  ;;  %p944_p4 = scmp.lt.u32.totalorder %s940_s5, %s1189_s10 }
 0x3ce   :  { %p946_p5 = pnand %p944_p4, %p941_p3 }
 0x3d0   :  { %949 = shalt.err (!%p946_p5)
}
 0x3d1   :  { %487 = dma.vmem_to_hbm [thread:$0]  %s485_s14, 128, %s1189_s10, [#allocation12]  }
 0x3d2   :  { %956 = dma.done.wait [#allocation4], 128  }
 0x3d3   :  { %957 = vsyncadd [#allocation4], 4294967168 }
 0x3d4   :  { %958 = dma.done.wait [#allocation12], 128  }
 0x3d5   :  { %959 = vsyncadd [#allocation12], 4294967168 }
 0x3d6   :  { %494 = vsyncpa [#allocation3], 1 }
 0x3d7   :  { %495 = vsyncpa [#allocation6], 1 }
 0x3d8   :  { %496 = vsyncpa [#allocation9], 1 }
 0x3d9   :  { %497 = vsyncpa [#allocation4], 1 }
 0x3da   :  { %498 = vsyncpa [#allocation12], 1 }

</bundles_post_ra>
